<compile_context>
chip_gen: v6e
topology: v6e:2x2x1
jax: 0.10.0
libtpu: 0.0.40
codegen_flags: <defaults>
</compile_context>

<pallas_src>
import functools

import numpy as np
import jax
import jax.numpy as jnp
from jax import lax
from jax.experimental import pallas as pl
from jax.experimental.pallas import tpu as pltpu


# ----------------------------------------------------------------------------
# Fused whole-network kernel (one grid step == one image)
# ----------------------------------------------------------------------------
def _cnn_fused_kernel(xe_ref, xo_ref, w1_ref, b1_ref, w2_ref, b2_ref,
                      fc1w_ref, fc1b_ref, fc2w_ref, fc2b_ref,
                      fc3w_ref, fc3b_ref, o_ref,
                      *, k1, k2, hp1, c2, ho2, hp2, wp2):
    """Whole CNN forward for one image.

    xe_ref/xo_ref : (1, ceil(H/2), W*Cin) even / odd input rows (NHWC, 2D-flat)
    w1_ref : (k1, W*Cin, 2*Wp1*C1)  stage-1 row-tap block-Toeplitz conv weight
             (W-conv and the dw in {0,1} pool branch folded into output columns)
    b1_ref : (1, Wp1*C1)
    w2_ref : (k2, Wp1*C1, Wo2*C2)   stage-2 row-tap block-Toeplitz conv weight
    b2_ref : (1, Wo2*C2)
    fc*    : FC head weights (pre-transposed; fc1 rows flatten-permuted)
    o_ref  : (1, 1, num_classes)
    """
    f32 = jnp.float32
    xe = xe_ref[0]                       # (ceil(H/2), W*Cin)
    xo = xo_ref[0]
    b1 = b1_ref[...]
    wp1c1 = b1.shape[1]                  # Wp1*C1

    # -- stage 1: BN1(folded) + conv1 + bias + ReLU + 2x2 max-pool ----------
    # conv output row 2*hp + dh needs input rows 2*hp + dh + i; for fixed
    # (dh, i) those are a CONTIGUOUS slice of the even- or odd-row array.
    pooled1 = None
    for dh in range(2):
        acc = None
        for i in range(k1):
            s = dh + i
            src = xe if (s % 2 == 0) else xo
            r0 = s // 2
            contrib = jnp.dot(src[r0:r0 + hp1, :], w1_ref[i],
                              preferred_element_type=f32)   # (Hp1, 2*Wp1*C1)
            acc = contrib if acc is None else acc + contrib
        for dw in range(2):              # max over the W pool branch
            branch = jnp.maximum(acc[:, dw * wp1c1:(dw + 1) * wp1c1] + b1, 0.0)
            pooled1 = branch if pooled1 is None else jnp.maximum(pooled1, branch)
    # pooled1 : (Hp1, Wp1*C1)  -- NHWC 2D-flat, stays in registers/VMEM

    # -- stage 2: BN2(folded) + conv2 + bias + ReLU -------------------------
    y2 = None
    for i in range(k2):
        contrib = jnp.dot(pooled1[i:i + ho2, :], w2_ref[i],
                          preferred_element_type=f32)        # (Ho2, Wo2*C2)
        y2 = contrib if y2 is None else y2 + contrib
    y2 = jnp.maximum(y2 + b2_ref[...], 0.0)

    # -- 2x2 max-pool + flatten (our order: hp2, wp2, c2) --------------------
    blocks = []
    for hp in range(hp2):
        for wp in range(wp2):
            blk = None
            for dh in range(2):
                for dw in range(2):
                    piece = y2[2 * hp + dh:2 * hp + dh + 1,
                               (2 * wp + dw) * c2:(2 * wp + dw + 1) * c2]
                    blk = piece if blk is None else jnp.maximum(blk, piece)
            blocks.append(blk)
    feat = blocks[0] if len(blocks) == 1 else jnp.concatenate(blocks, axis=-1)

    # -- FC head (dropout p=0.0 is identity) ---------------------------------
    h = jnp.maximum(jnp.dot(feat, fc1w_ref[...], preferred_element_type=f32)
                    + fc1b_ref[...], 0.0)
    h = jnp.maximum(jnp.dot(h, fc2w_ref[...], preferred_element_type=f32)
                    + fc2b_ref[...], 0.0)
    out = jnp.dot(h, fc3w_ref[...], preferred_element_type=f32) + fc3b_ref[...]
    o_ref[0] = out.astype(o_ref.dtype)


# ----------------------------------------------------------------------------
# One-time parameter preparation (hoisted out of the forward)
# ----------------------------------------------------------------------------
def _fold_bn_into_conv(w_oihw, b_o, gamma, beta, mean, var, eps=1e-5):
    """Fold inference-mode BatchNorm2d (on the conv INPUT) into the conv."""
    scale = gamma / jnp.sqrt(var + eps)          # (Cin,)
    shift = beta - mean * scale                  # (Cin,)
    w_f = w_oihw * scale[None, :, None, None]
    b_f = b_o + jnp.einsum("oihw,i->o", w_oihw, shift)
    return w_f, b_f


def prepare_params(params, input_size):
    """Fold BN, build block-Toeplitz conv weights, transpose FC weights. Once."""
    (w1, b1, w2, b2, fc1_w, fc1_b, fc2_w, fc2_b, fc3_w, fc3_b,
     g1, be1, m1, v1, g2, be2, m2, v2) = params
    cin, h, w = input_size
    c1, k1 = w1.shape[0], w1.shape[2]
    c2, k2 = w2.shape[0], w2.shape[2]
    ho1, wo1 = h - k1 + 1, w - k1 + 1
    hp1, wp1 = ho1 // 2, wo1 // 2
    ho2, wo2 = hp1 - k2 + 1, wp1 - k2 + 1
    hp2, wp2 = ho2 // 2, wo2 // 2

    w1f, b1f = _fold_bn_into_conv(w1, b1, g1, be1, m1, v1)
    w2f, b2f = _fold_bn_into_conv(w2, b2, g2, be2, m2, v2)

    # stage-1 Toeplitz: T1[i, w*Cin+ci, dw*(Wp1*C1)+wp*C1+co] = w1f[co,ci,i,j]
    # iff w == 2*wp + dw + j  (W-conv and W-pool branch folded into columns).
    s1 = np.zeros((2, wp1, k1, w), np.float32)
    for d in range(2):
        for p in range(wp1):
            for j in range(k1):
                s1[d, p, j, 2 * p + d + j] = 1.0
    w1t = jnp.einsum('dpjw,ocij->iwcdpo', s1, w1f).reshape(
        k1, w * cin, 2 * wp1 * c1)
    b1row = jnp.tile(b1f, wp1).reshape(1, wp1 * c1)

    # stage-2 Toeplitz: T2[i, w*C1+ci, wo*C2+co] = w2f[co,ci,i,j] iff w == wo+j.
    s2 = np.zeros((wo2, k2, wp1), np.float32)
    for q in range(wo2):
        for j in range(k2):
            s2[q, j, q + j] = 1.0
    w2t = jnp.einsum('qjw,ocij->iwcqo', s2, w2f).reshape(
        k2, wp1 * c1, wo2 * c2)
    b2row = jnp.tile(b2f, wo2).reshape(1, wo2 * c2)

    # FC head: permute fc1 rows from torch flatten order (c2,hp2,wp2) to ours
    # (hp2,wp2,c2); transpose the rest.  (Identity permutation when hp2=wp2=1.)
    n1, n2, nout = fc1_w.shape[0], fc2_w.shape[0], fc3_w.shape[0]
    fc1_wk = fc1_w.reshape(n1, c2, hp2, wp2).transpose(2, 3, 1, 0).reshape(
        hp2 * wp2 * c2, n1)
    kparams = (w1t, b1row, w2t, b2row,
               fc1_wk, fc1_b.reshape(1, n1),
               fc2_w.T, fc2_b.reshape(1, n2),
               fc3_w.T, fc3_b.reshape(1, nout))
    meta = dict(k1=k1, k2=k2, hp1=hp1, c2=c2, ho2=ho2, hp2=hp2, wp2=wp2)
    return kparams, meta


# ----------------------------------------------------------------------------
# Forward pass: one pallas_call, grid over batch ("parallel")
# ----------------------------------------------------------------------------
def _const_spec(shape):
    nd = len(shape)

    def idx(i):
        return (0,) * nd

    return pl.BlockSpec(shape, idx)


def cnn_forward(x, kparams, *, meta):
    (w1t, b1row, w2t, b2row, fc1w, fc1b, fc2w, fc2b, fc3w, fc3b) = kparams
    n, cin, h, w = x.shape
    nout = fc3w.shape[1]

    # Layout plumbing on the tiny raw input (~6 KB): NCHW -> NHWC flattened to
    # 2D rows (W*Cin lanes), rows de-interleaved into even/odd for the H-pool.
    x2 = jnp.transpose(x, (0, 2, 3, 1)).reshape(n, h, w * cin)
    xe = x2[:, 0::2, :]
    xo = x2[:, 1::2, :]

    flops = n * (2 * meta['k1'] * 2 * meta['hp1'] * (w * cin) * w1t.shape[2]
                 + meta['k2'] * 2 * meta['ho2'] * w2t.shape[1] * w2t.shape[2]
                 + 2 * (fc1w.shape[0] * fc1w.shape[1]
                        + fc2w.shape[0] * fc2w.shape[1]
                        + fc3w.shape[0] * fc3w.shape[1]))
    weight_bytes = 4 * sum(int(np.prod(a.shape)) for a in kparams)
    cost = pl.CostEstimate(
        flops=int(flops), transcendentals=0,
        bytes_accessed=int(4 * (xe.size + xo.size + n * nout) + weight_bytes))

    out = pl.pallas_call(
        functools.partial(_cnn_fused_kernel, **meta),
        out_shape=jax.ShapeDtypeStruct((n, 1, nout), jnp.float32),
        grid=(n,),
        in_specs=[
            pl.BlockSpec((1,) + xe.shape[1:], lambda i: (i, 0, 0)),
            pl.BlockSpec((1,) + xo.shape[1:], lambda i: (i, 0, 0)),
            _const_spec(w1t.shape), _const_spec(b1row.shape),
            _const_spec(w2t.shape), _const_spec(b2row.shape),
            _const_spec(fc1w.shape), _const_spec(fc1b.shape),
            _const_spec(fc2w.shape), _const_spec(fc2b.shape),
            _const_spec(fc3w.shape), _const_spec(fc3b.shape),
        ],
        out_specs=pl.BlockSpec((1, 1, nout), lambda i: (i, 0, 0)),
        compiler_params=pltpu.CompilerParams(
            dimension_semantics=("parallel",)),
        cost_estimate=cost,
    )(xe, xo, w1t, b1row, w2t, b2row, fc1w, fc1b, fc2w, fc2b, fc3w, fc3b)
    return out.reshape(n, nout)


# ----------------------------------------------------------------------------
# Pure-JAX reference (unfused) for correctness checking
# ----------------------------------------------------------------------------
def reference_forward(x, params):
    (w1, b1, w2, b2, fc1_w, fc1_b, fc2_w, fc2_b, fc3_w, fc3_b,
     g1, be1, m1, v1, g2, be2, m2, v2) = params
    eps = 1e-5

    def bn(x, g, b, m, v):
        return (x - m[None, :, None, None]) * (
            g[None, :, None, None] / jnp.sqrt(v[None, :, None, None] + eps)
        ) + b[None, :, None, None]

    def conv(x, w, b):
        y = lax.conv_general_dilated(
            x, w, window_strides=(1, 1), padding="VALID",
            dimension_numbers=("NCHW", "OIHW", "NCHW"))
        return y + b[None, :, None, None]

    def pool(x):
        return lax.reduce_window(x, -jnp.inf, lax.max,
                                 (1, 1, 2, 2), (1, 1, 2, 2), "VALID")

    x = bn(x, g1, be1, m1, v1)
    x = pool(jax.nn.relu(conv(x, w1, b1)))
    x = bn(x, g2, be2, m2, v2)
    x = pool(jax.nn.relu(conv(x, w2, b2)))
    x = x.reshape(x.shape[0], -1)
    x = jax.nn.relu(x @ fc1_w.T + fc1_b)
    x = jax.nn.relu(x @ fc2_w.T + fc2_b)
    return x @ fc3_w.T + fc3_b


# ----------------------------------------------------------------------------
# Demo / self-check
# ----------------------------------------------------------------------------
if __name__ == "__main__":
    key = jax.random.PRNGKey(0)

    N = 2
    input_size = (3, 16, 16)          # (C, H, W)
    conv_channels = (3, 10)
    kernel = (5, 5)

    cin, h, w = input_size
    c1, c2 = conv_channels
    k1, k2 = kernel
    hp2 = ((h - k1 + 1) // 2 - k2 + 1) // 2
    wp2 = ((w - k1 + 1) // 2 - k2 + 1) // 2
    num_flattened = hp2 * wp2 * c2

    keys = jax.random.split(key, 19)

    def rnd(k, shape, scale=0.1):
        return scale * jax.random.normal(k, shape, dtype=jnp.float32)

    w1 = rnd(keys[0], (c1, cin, k1, k1))
    b1 = rnd(keys[1], (c1,))
    w2 = rnd(keys[2], (c2, c1, k2, k2))
    b2 = rnd(keys[3], (c2,))
    fc1_w = rnd(keys[4], (120, num_flattened))
    fc1_b = rnd(keys[5], (120,))
    fc2_w = rnd(keys[6], (84, 120))
    fc2_b = rnd(keys[7], (84,))
    fc3_w = rnd(keys[8], (2, 84))
    fc3_b = rnd(keys[9], (2,))
    g1 = 1.0 + rnd(keys[10], (cin,))
    be1 = rnd(keys[11], (cin,))
    m1 = rnd(keys[12], (cin,))
    v1 = 1.0 + 0.5 * jax.random.uniform(keys[13], (cin,), dtype=jnp.float32)
    g2 = 1.0 + rnd(keys[14], (c1,))
    be2 = rnd(keys[15], (c1,))
    m2 = rnd(keys[16], (c1,))
    v2 = 1.0 + 0.5 * jax.random.uniform(keys[17], (c1,), dtype=jnp.float32)

    x = jax.random.normal(keys[18], (N, cin, h, w), dtype=jnp.float32)

    params = (w1, b1, w2, b2, fc1_w, fc1_b, fc2_w, fc2_b, fc3_w, fc3_b,
              g1, be1, m1, v1, g2, be2, m2, v2)

    # One-time prep (hoisted): BN fold, Toeplitz conv weights, FC transposes.
    kparams, meta = prepare_params(params, input_size)
    fwd = jax.jit(functools.partial(cnn_forward, meta=meta))

    out = jax.block_until_ready(fwd(x, kparams))
    ref = jax.block_until_ready(reference_forward(x, params))

    assert out.shape == (N, 2), out.shape
    assert out.dtype == jnp.float32
    assert jnp.allclose(out, ref, atol=1e-4, rtol=1e-3), (
        "max abs err = %e" % float(jnp.max(jnp.abs(out - ref))))

    print("KERNEL_OK")
</pallas_src>

<mosaic_0001>
module attributes {stable_mosaic.version = 11 : i64} {
  func.func @_cnn_fused_kernel(%arg0: i32, %arg1: memref<1x8x48xf32, #tpu.memory_space<vmem>>, %arg2: memref<1x8x48xf32, #tpu.memory_space<vmem>>, %arg3: memref<5x48x36xf32, #tpu.memory_space<vmem>>, %arg4: memref<1x18xf32, #tpu.memory_space<vmem>>, %arg5: memref<5x18x20xf32, #tpu.memory_space<vmem>>, %arg6: memref<1x20xf32, #tpu.memory_space<vmem>>, %arg7: memref<10x120xf32, #tpu.memory_space<vmem>>, %arg8: memref<1x120xf32, #tpu.memory_space<vmem>>, %arg9: memref<120x84xf32, #tpu.memory_space<vmem>>, %arg10: memref<1x84xf32, #tpu.memory_space<vmem>>, %arg11: memref<84x2xf32, #tpu.memory_space<vmem>>, %arg12: memref<1x2xf32, #tpu.memory_space<vmem>>, %arg13: memref<1x1x2xf32, #tpu.memory_space<vmem>>) attributes {dimension_semantics = [#tpu.dimension_semantics<parallel>], iteration_bounds = array<i64: 2>, scalar_prefetch = 0 : i64, scratch_operands = 0 : i64, tpu.core_type = #tpu.core_type<tc>, window_params = [{transform_indices = @transform_0, window_bounds = array<i64: 1, 8, 48>}, {transform_indices = @transform_1, window_bounds = array<i64: 1, 8, 48>}, {pipeline_mode = #tpu.pipeline_mode<synchronous>, transform_indices = @transform_2, window_bounds = array<i64: 5, 48, 36>}, {pipeline_mode = #tpu.pipeline_mode<synchronous>, transform_indices = @transform_3, window_bounds = array<i64: 1, 18>}, {pipeline_mode = #tpu.pipeline_mode<synchronous>, transform_indices = @transform_4, window_bounds = array<i64: 5, 18, 20>}, {pipeline_mode = #tpu.pipeline_mode<synchronous>, transform_indices = @transform_5, window_bounds = array<i64: 1, 20>}, {pipeline_mode = #tpu.pipeline_mode<synchronous>, transform_indices = @transform_6, window_bounds = array<i64: 10, 120>}, {pipeline_mode = #tpu.pipeline_mode<synchronous>, transform_indices = @transform_7, window_bounds = array<i64: 1, 120>}, {pipeline_mode = #tpu.pipeline_mode<synchronous>, transform_indices = @transform_8, window_bounds = array<i64: 120, 84>}, {pipeline_mode = #tpu.pipeline_mode<synchronous>, transform_indices = @transform_9, window_bounds = array<i64: 1, 84>}, {pipeline_mode = #tpu.pipeline_mode<synchronous>, transform_indices = @transform_10, window_bounds = array<i64: 84, 2>}, {pipeline_mode = #tpu.pipeline_mode<synchronous>, transform_indices = @transform_11, window_bounds = array<i64: 1, 2>}, {transform_indices = @transform_12, window_bounds = array<i64: 1, 1, 2>}]} {
    %c0 = arith.constant 0 : index
    %c0_0 = arith.constant 0 : index
    %c0_1 = arith.constant 0 : index
    %0 = vector.load %arg1[%c0, %c0_0, %c0_1] : memref<1x8x48xf32, #tpu.memory_space<vmem>>, vector<1x8x48xf32>
    %1 = vector.shape_cast %0 : vector<1x8x48xf32> to vector<8x48xf32>
    %c0_2 = arith.constant 0 : index
    %c0_3 = arith.constant 0 : index
    %c0_4 = arith.constant 0 : index
    %2 = vector.load %arg2[%c0_2, %c0_3, %c0_4] : memref<1x8x48xf32, #tpu.memory_space<vmem>>, vector<1x8x48xf32>
    %3 = vector.shape_cast %2 : vector<1x8x48xf32> to vector<8x48xf32>
    %c0_5 = arith.constant 0 : index
    %c0_6 = arith.constant 0 : index
    %4 = vector.load %arg4[%c0_5, %c0_6] : memref<1x18xf32, #tpu.memory_space<vmem>>, vector<1x18xf32>
    %5 = vector.extract_strided_slice %1 {offsets = [0, 0], sizes = [6, 48], strides = [1, 1]} : vector<8x48xf32> to vector<6x48xf32>
    %c0_7 = arith.constant 0 : index
    %c0_8 = arith.constant 0 : index
    %c0_9 = arith.constant 0 : index
    %6 = vector.load %arg3[%c0_7, %c0_8, %c0_9] : memref<5x48x36xf32, #tpu.memory_space<vmem>>, vector<1x48x36xf32>
    %7 = vector.shape_cast %6 : vector<1x48x36xf32> to vector<48x36xf32>
    %cst = arith.constant dense<0.000000e+00> : vector<6x36xf32>
    %8 = tpu.matmul %5, %7, %cst {dimension_numbers = #tpu.dot_dimension_numbers<[1], [0], [0], [1], [0, 0, 1, 1], [], []>} : vector<6x48xf32>, vector<48x36xf32>, vector<6x36xf32> -> vector<6x36xf32>
    %9 = vector.extract_strided_slice %3 {offsets = [0, 0], sizes = [6, 48], strides = [1, 1]} : vector<8x48xf32> to vector<6x48xf32>
    %c1 = arith.constant 1 : index
    %c0_10 = arith.constant 0 : index
    %c0_11 = arith.constant 0 : index
    %10 = vector.load %arg3[%c1, %c0_10, %c0_11] : memref<5x48x36xf32, #tpu.memory_space<vmem>>, vector<1x48x36xf32>
    %11 = vector.shape_cast %10 : vector<1x48x36xf32> to vector<48x36xf32>
    %cst_12 = arith.constant dense<0.000000e+00> : vector<6x36xf32>
    %12 = tpu.matmul %9, %11, %cst_12 {dimension_numbers = #tpu.dot_dimension_numbers<[1], [0], [0], [1], [0, 0, 1, 1], [], []>} : vector<6x48xf32>, vector<48x36xf32>, vector<6x36xf32> -> vector<6x36xf32>
    %13 = arith.addf %8, %12 : vector<6x36xf32>
    %14 = vector.extract_strided_slice %1 {offsets = [1, 0], sizes = [6, 48], strides = [1, 1]} : vector<8x48xf32> to vector<6x48xf32>
    %c2 = arith.constant 2 : index
    %c0_13 = arith.constant 0 : index
    %c0_14 = arith.constant 0 : index
    %15 = vector.load %arg3[%c2, %c0_13, %c0_14] : memref<5x48x36xf32, #tpu.memory_space<vmem>>, vector<1x48x36xf32>
    %16 = vector.shape_cast %15 : vector<1x48x36xf32> to vector<48x36xf32>
    %cst_15 = arith.constant dense<0.000000e+00> : vector<6x36xf32>
    %17 = tpu.matmul %14, %16, %cst_15 {dimension_numbers = #tpu.dot_dimension_numbers<[1], [0], [0], [1], [0, 0, 1, 1], [], []>} : vector<6x48xf32>, vector<48x36xf32>, vector<6x36xf32> -> vector<6x36xf32>
    %18 = arith.addf %13, %17 : vector<6x36xf32>
    %19 = vector.extract_strided_slice %3 {offsets = [1, 0], sizes = [6, 48], strides = [1, 1]} : vector<8x48xf32> to vector<6x48xf32>
    %c3 = arith.constant 3 : index
    %c0_16 = arith.constant 0 : index
    %c0_17 = arith.constant 0 : index
    %20 = vector.load %arg3[%c3, %c0_16, %c0_17] : memref<5x48x36xf32, #tpu.memory_space<vmem>>, vector<1x48x36xf32>
    %21 = vector.shape_cast %20 : vector<1x48x36xf32> to vector<48x36xf32>
    %cst_18 = arith.constant dense<0.000000e+00> : vector<6x36xf32>
    %22 = tpu.matmul %19, %21, %cst_18 {dimension_numbers = #tpu.dot_dimension_numbers<[1], [0], [0], [1], [0, 0, 1, 1], [], []>} : vector<6x48xf32>, vector<48x36xf32>, vector<6x36xf32> -> vector<6x36xf32>
    %23 = arith.addf %18, %22 : vector<6x36xf32>
    %24 = vector.extract_strided_slice %1 {offsets = [2, 0], sizes = [6, 48], strides = [1, 1]} : vector<8x48xf32> to vector<6x48xf32>
    %c4 = arith.constant 4 : index
    %c0_19 = arith.constant 0 : index
    %c0_20 = arith.constant 0 : index
    %25 = vector.load %arg3[%c4, %c0_19, %c0_20] : memref<5x48x36xf32, #tpu.memory_space<vmem>>, vector<1x48x36xf32>
    %26 = vector.shape_cast %25 : vector<1x48x36xf32> to vector<48x36xf32>
    %cst_21 = arith.constant dense<0.000000e+00> : vector<6x36xf32>
    %27 = tpu.matmul %24, %26, %cst_21 {dimension_numbers = #tpu.dot_dimension_numbers<[1], [0], [0], [1], [0, 0, 1, 1], [], []>} : vector<6x48xf32>, vector<48x36xf32>, vector<6x36xf32> -> vector<6x36xf32>
    %28 = arith.addf %23, %27 : vector<6x36xf32>
    %29 = vector.extract_strided_slice %28 {offsets = [0, 0], sizes = [6, 18], strides = [1, 1]} : vector<6x36xf32> to vector<6x18xf32>
    %30 = vector.broadcast %4 : vector<1x18xf32> to vector<6x18xf32>
    %31 = arith.addf %29, %30 : vector<6x18xf32>
    %cst_22 = arith.constant 0.000000e+00 : f32
    %32 = vector.broadcast %cst_22 : f32 to vector<6x18xf32>
    %33 = arith.maximumf %31, %32 : vector<6x18xf32>
    %34 = vector.extract_strided_slice %28 {offsets = [0, 18], sizes = [6, 18], strides = [1, 1]} : vector<6x36xf32> to vector<6x18xf32>
    %35 = vector.broadcast %4 : vector<1x18xf32> to vector<6x18xf32>
    %36 = arith.addf %34, %35 : vector<6x18xf32>
    %cst_23 = arith.constant 0.000000e+00 : f32
    %37 = vector.broadcast %cst_23 : f32 to vector<6x18xf32>
    %38 = arith.maximumf %36, %37 : vector<6x18xf32>
    %39 = arith.maximumf %33, %38 : vector<6x18xf32>
    %40 = vector.extract_strided_slice %3 {offsets = [0, 0], sizes = [6, 48], strides = [1, 1]} : vector<8x48xf32> to vector<6x48xf32>
    %c0_24 = arith.constant 0 : index
    %c0_25 = arith.constant 0 : index
    %c0_26 = arith.constant 0 : index
    %41 = vector.load %arg3[%c0_24, %c0_25, %c0_26] : memref<5x48x36xf32, #tpu.memory_space<vmem>>, vector<1x48x36xf32>
    %42 = vector.shape_cast %41 : vector<1x48x36xf32> to vector<48x36xf32>
    %cst_27 = arith.constant dense<0.000000e+00> : vector<6x36xf32>
    %43 = tpu.matmul %40, %42, %cst_27 {dimension_numbers = #tpu.dot_dimension_numbers<[1], [0], [0], [1], [0, 0, 1, 1], [], []>} : vector<6x48xf32>, vector<48x36xf32>, vector<6x36xf32> -> vector<6x36xf32>
    %44 = vector.extract_strided_slice %1 {offsets = [1, 0], sizes = [6, 48], strides = [1, 1]} : vector<8x48xf32> to vector<6x48xf32>
    %c1_28 = arith.constant 1 : index
    %c0_29 = arith.constant 0 : index
    %c0_30 = arith.constant 0 : index
    %45 = vector.load %arg3[%c1_28, %c0_29, %c0_30] : memref<5x48x36xf32, #tpu.memory_space<vmem>>, vector<1x48x36xf32>
    %46 = vector.shape_cast %45 : vector<1x48x36xf32> to vector<48x36xf32>
    %cst_31 = arith.constant dense<0.000000e+00> : vector<6x36xf32>
    %47 = tpu.matmul %44, %46, %cst_31 {dimension_numbers = #tpu.dot_dimension_numbers<[1], [0], [0], [1], [0, 0, 1, 1], [], []>} : vector<6x48xf32>, vector<48x36xf32>, vector<6x36xf32> -> vector<6x36xf32>
    %48 = arith.addf %43, %47 : vector<6x36xf32>
    %49 = vector.extract_strided_slice %3 {offsets = [1, 0], sizes = [6, 48], strides = [1, 1]} : vector<8x48xf32> to vector<6x48xf32>
    %c2_32 = arith.constant 2 : index
    %c0_33 = arith.constant 0 : index
    %c0_34 = arith.constant 0 : index
    %50 = vector.load %arg3[%c2_32, %c0_33, %c0_34] : memref<5x48x36xf32, #tpu.memory_space<vmem>>, vector<1x48x36xf32>
    %51 = vector.shape_cast %50 : vector<1x48x36xf32> to vector<48x36xf32>
    %cst_35 = arith.constant dense<0.000000e+00> : vector<6x36xf32>
    %52 = tpu.matmul %49, %51, %cst_35 {dimension_numbers = #tpu.dot_dimension_numbers<[1], [0], [0], [1], [0, 0, 1, 1], [], []>} : vector<6x48xf32>, vector<48x36xf32>, vector<6x36xf32> -> vector<6x36xf32>
    %53 = arith.addf %48, %52 : vector<6x36xf32>
    %54 = vector.extract_strided_slice %1 {offsets = [2, 0], sizes = [6, 48], strides = [1, 1]} : vector<8x48xf32> to vector<6x48xf32>
    %c3_36 = arith.constant 3 : index
    %c0_37 = arith.constant 0 : index
    %c0_38 = arith.constant 0 : index
    %55 = vector.load %arg3[%c3_36, %c0_37, %c0_38] : memref<5x48x36xf32, #tpu.memory_space<vmem>>, vector<1x48x36xf32>
    %56 = vector.shape_cast %55 : vector<1x48x36xf32> to vector<48x36xf32>
    %cst_39 = arith.constant dense<0.000000e+00> : vector<6x36xf32>
    %57 = tpu.matmul %54, %56, %cst_39 {dimension_numbers = #tpu.dot_dimension_numbers<[1], [0], [0], [1], [0, 0, 1, 1], [], []>} : vector<6x48xf32>, vector<48x36xf32>, vector<6x36xf32> -> vector<6x36xf32>
    %58 = arith.addf %53, %57 : vector<6x36xf32>
    %59 = vector.extract_strided_slice %3 {offsets = [2, 0], sizes = [6, 48], strides = [1, 1]} : vector<8x48xf32> to vector<6x48xf32>
    %c4_40 = arith.constant 4 : index
    %c0_41 = arith.constant 0 : index
    %c0_42 = arith.constant 0 : index
    %60 = vector.load %arg3[%c4_40, %c0_41, %c0_42] : memref<5x48x36xf32, #tpu.memory_space<vmem>>, vector<1x48x36xf32>
    %61 = vector.shape_cast %60 : vector<1x48x36xf32> to vector<48x36xf32>
    %cst_43 = arith.constant dense<0.000000e+00> : vector<6x36xf32>
    %62 = tpu.matmul %59, %61, %cst_43 {dimension_numbers = #tpu.dot_dimension_numbers<[1], [0], [0], [1], [0, 0, 1, 1], [], []>} : vector<6x48xf32>, vector<48x36xf32>, vector<6x36xf32> -> vector<6x36xf32>
    %63 = arith.addf %58, %62 : vector<6x36xf32>
    %64 = vector.extract_strided_slice %63 {offsets = [0, 0], sizes = [6, 18], strides = [1, 1]} : vector<6x36xf32> to vector<6x18xf32>
    %65 = vector.broadcast %4 : vector<1x18xf32> to vector<6x18xf32>
    %66 = arith.addf %64, %65 : vector<6x18xf32>
    %cst_44 = arith.constant 0.000000e+00 : f32
    %67 = vector.broadcast %cst_44 : f32 to vector<6x18xf32>
    %68 = arith.maximumf %66, %67 : vector<6x18xf32>
    %69 = arith.maximumf %39, %68 : vector<6x18xf32>
    %70 = vector.extract_strided_slice %63 {offsets = [0, 18], sizes = [6, 18], strides = [1, 1]} : vector<6x36xf32> to vector<6x18xf32>
    %71 = vector.broadcast %4 : vector<1x18xf32> to vector<6x18xf32>
    %72 = arith.addf %70, %71 : vector<6x18xf32>
    %cst_45 = arith.constant 0.000000e+00 : f32
    %73 = vector.broadcast %cst_45 : f32 to vector<6x18xf32>
    %74 = arith.maximumf %72, %73 : vector<6x18xf32>
    %75 = arith.maximumf %69, %74 : vector<6x18xf32>
    %76 = vector.extract_strided_slice %75 {offsets = [0, 0], sizes = [2, 18], strides = [1, 1]} : vector<6x18xf32> to vector<2x18xf32>
    %c0_46 = arith.constant 0 : index
    %c0_47 = arith.constant 0 : index
    %c0_48 = arith.constant 0 : index
    %77 = vector.load %arg5[%c0_46, %c0_47, %c0_48] : memref<5x18x20xf32, #tpu.memory_space<vmem>>, vector<1x18x20xf32>
    %78 = vector.shape_cast %77 : vector<1x18x20xf32> to vector<18x20xf32>
    %cst_49 = arith.constant dense<0.000000e+00> : vector<2x20xf32>
    %79 = tpu.matmul %76, %78, %cst_49 {dimension_numbers = #tpu.dot_dimension_numbers<[1], [0], [0], [1], [0, 0, 1, 1], [], []>} : vector<2x18xf32>, vector<18x20xf32>, vector<2x20xf32> -> vector<2x20xf32>
    %80 = vector.extract_strided_slice %75 {offsets = [1, 0], sizes = [2, 18], strides = [1, 1]} : vector<6x18xf32> to vector<2x18xf32>
    %c1_50 = arith.constant 1 : index
    %c0_51 = arith.constant 0 : index
    %c0_52 = arith.constant 0 : index
    %81 = vector.load %arg5[%c1_50, %c0_51, %c0_52] : memref<5x18x20xf32, #tpu.memory_space<vmem>>, vector<1x18x20xf32>
    %82 = vector.shape_cast %81 : vector<1x18x20xf32> to vector<18x20xf32>
    %cst_53 = arith.constant dense<0.000000e+00> : vector<2x20xf32>
    %83 = tpu.matmul %80, %82, %cst_53 {dimension_numbers = #tpu.dot_dimension_numbers<[1], [0], [0], [1], [0, 0, 1, 1], [], []>} : vector<2x18xf32>, vector<18x20xf32>, vector<2x20xf32> -> vector<2x20xf32>
    %84 = arith.addf %79, %83 : vector<2x20xf32>
    %85 = vector.extract_strided_slice %75 {offsets = [2, 0], sizes = [2, 18], strides = [1, 1]} : vector<6x18xf32> to vector<2x18xf32>
    %c2_54 = arith.constant 2 : index
    %c0_55 = arith.constant 0 : index
    %c0_56 = arith.constant 0 : index
    %86 = vector.load %arg5[%c2_54, %c0_55, %c0_56] : memref<5x18x20xf32, #tpu.memory_space<vmem>>, vector<1x18x20xf32>
    %87 = vector.shape_cast %86 : vector<1x18x20xf32> to vector<18x20xf32>
    %cst_57 = arith.constant dense<0.000000e+00> : vector<2x20xf32>
    %88 = tpu.matmul %85, %87, %cst_57 {dimension_numbers = #tpu.dot_dimension_numbers<[1], [0], [0], [1], [0, 0, 1, 1], [], []>} : vector<2x18xf32>, vector<18x20xf32>, vector<2x20xf32> -> vector<2x20xf32>
    %89 = arith.addf %84, %88 : vector<2x20xf32>
    %90 = vector.extract_strided_slice %75 {offsets = [3, 0], sizes = [2, 18], strides = [1, 1]} : vector<6x18xf32> to vector<2x18xf32>
    %c3_58 = arith.constant 3 : index
    %c0_59 = arith.constant 0 : index
    %c0_60 = arith.constant 0 : index
    %91 = vector.load %arg5[%c3_58, %c0_59, %c0_60] : memref<5x18x20xf32, #tpu.memory_space<vmem>>, vector<1x18x20xf32>
    %92 = vector.shape_cast %91 : vector<1x18x20xf32> to vector<18x20xf32>
    %cst_61 = arith.constant dense<0.000000e+00> : vector<2x20xf32>
    %93 = tpu.matmul %90, %92, %cst_61 {dimension_numbers = #tpu.dot_dimension_numbers<[1], [0], [0], [1], [0, 0, 1, 1], [], []>} : vector<2x18xf32>, vector<18x20xf32>, vector<2x20xf32> -> vector<2x20xf32>
    %94 = arith.addf %89, %93 : vector<2x20xf32>
    %95 = vector.extract_strided_slice %75 {offsets = [4, 0], sizes = [2, 18], strides = [1, 1]} : vector<6x18xf32> to vector<2x18xf32>
    %c4_62 = arith.constant 4 : index
    %c0_63 = arith.constant 0 : index
    %c0_64 = arith.constant 0 : index
    %96 = vector.load %arg5[%c4_62, %c0_63, %c0_64] : memref<5x18x20xf32, #tpu.memory_space<vmem>>, vector<1x18x20xf32>
    %97 = vector.shape_cast %96 : vector<1x18x20xf32> to vector<18x20xf32>
    %cst_65 = arith.constant dense<0.000000e+00> : vector<2x20xf32>
    %98 = tpu.matmul %95, %97, %cst_65 {dimension_numbers = #tpu.dot_dimension_numbers<[1], [0], [0], [1], [0, 0, 1, 1], [], []>} : vector<2x18xf32>, vector<18x20xf32>, vector<2x20xf32> -> vector<2x20xf32>
    %99 = arith.addf %94, %98 : vector<2x20xf32>
    %c0_66 = arith.constant 0 : index
    %c0_67 = arith.constant 0 : index
    %100 = vector.load %arg6[%c0_66, %c0_67] : memref<1x20xf32, #tpu.memory_space<vmem>>, vector<1x20xf32>
    %101 = vector.broadcast %100 : vector<1x20xf32> to vector<2x20xf32>
    %102 = arith.addf %99, %101 : vector<2x20xf32>
    %cst_68 = arith.constant 0.000000e+00 : f32
    %103 = vector.broadcast %cst_68 : f32 to vector<2x20xf32>
    %104 = arith.maximumf %102, %103 : vector<2x20xf32>
    %105 = vector.extract_strided_slice %104 {offsets = [0, 0], sizes = [1, 10], strides = [1, 1]} : vector<2x20xf32> to vector<1x10xf32>
    %106 = vector.extract_strided_slice %104 {offsets = [0, 10], sizes = [1, 10], strides = [1, 1]} : vector<2x20xf32> to vector<1x10xf32>
    %107 = arith.maximumf %105, %106 : vector<1x10xf32>
    %108 = vector.extract_strided_slice %104 {offsets = [1, 0], sizes = [1, 10], strides = [1, 1]} : vector<2x20xf32> to vector<1x10xf32>
    %109 = arith.maximumf %107, %108 : vector<1x10xf32>
    %110 = vector.extract_strided_slice %104 {offsets = [1, 10], sizes = [1, 10], strides = [1, 1]} : vector<2x20xf32> to vector<1x10xf32>
    %111 = arith.maximumf %109, %110 : vector<1x10xf32>
    %c0_69 = arith.constant 0 : index
    %c0_70 = arith.constant 0 : index
    %112 = vector.load %arg7[%c0_69, %c0_70] : memref<10x120xf32, #tpu.memory_space<vmem>>, vector<10x120xf32>
    %cst_71 = arith.constant dense<0.000000e+00> : vector<1x120xf32>
    %113 = tpu.matmul %111, %112, %cst_71 {dimension_numbers = #tpu.dot_dimension_numbers<[1], [0], [0], [1], [0, 0, 1, 1], [], []>} : vector<1x10xf32>, vector<10x120xf32>, vector<1x120xf32> -> vector<1x120xf32>
    %c0_72 = arith.constant 0 : index
    %c0_73 = arith.constant 0 : index
    %114 = vector.load %arg8[%c0_72, %c0_73] : memref<1x120xf32, #tpu.memory_space<vmem>>, vector<1x120xf32>
    %115 = arith.addf %113, %114 : vector<1x120xf32>
    %cst_74 = arith.constant 0.000000e+00 : f32
    %116 = vector.broadcast %cst_74 : f32 to vector<1x120xf32>
    %117 = arith.maximumf %115, %116 : vector<1x120xf32>
    %c0_75 = arith.constant 0 : index
    %c0_76 = arith.constant 0 : index
    %118 = vector.load %arg9[%c0_75, %c0_76] : memref<120x84xf32, #tpu.memory_space<vmem>>, vector<120x84xf32>
    %cst_77 = arith.constant dense<0.000000e+00> : vector<1x84xf32>
    %119 = tpu.matmul %117, %118, %cst_77 {dimension_numbers = #tpu.dot_dimension_numbers<[1], [0], [0], [1], [0, 0, 1, 1], [], []>} : vector<1x120xf32>, vector<120x84xf32>, vector<1x84xf32> -> vector<1x84xf32>
    %c0_78 = arith.constant 0 : index
    %c0_79 = arith.constant 0 : index
    %120 = vector.load %arg10[%c0_78, %c0_79] : memref<1x84xf32, #tpu.memory_space<vmem>>, vector<1x84xf32>
    %121 = arith.addf %119, %120 : vector<1x84xf32>
    %cst_80 = arith.constant 0.000000e+00 : f32
    %122 = vector.broadcast %cst_80 : f32 to vector<1x84xf32>
    %123 = arith.maximumf %121, %122 : vector<1x84xf32>
    %c0_81 = arith.constant 0 : index
    %c0_82 = arith.constant 0 : index
    %124 = vector.load %arg11[%c0_81, %c0_82] : memref<84x2xf32, #tpu.memory_space<vmem>>, vector<84x2xf32>
    %cst_83 = arith.constant dense<0.000000e+00> : vector<1x2xf32>
    %125 = tpu.matmul %123, %124, %cst_83 {dimension_numbers = #tpu.dot_dimension_numbers<[1], [0], [0], [1], [0, 0, 1, 1], [], []>} : vector<1x84xf32>, vector<84x2xf32>, vector<1x2xf32> -> vector<1x2xf32>
    %c0_84 = arith.constant 0 : index
    %c0_85 = arith.constant 0 : index
    %126 = vector.load %arg12[%c0_84, %c0_85] : memref<1x2xf32, #tpu.memory_space<vmem>>, vector<1x2xf32>
    %127 = arith.addf %125, %126 : vector<1x2xf32>
    %c0_86 = arith.constant 0 : index
    %c0_87 = arith.constant 0 : index
    %c0_88 = arith.constant 0 : index
    %128 = vector.load %arg13[%c0_86, %c0_87, %c0_88] : memref<1x1x2xf32, #tpu.memory_space<vmem>>, vector<1x1x2xf32>
    %129 = vector.shape_cast %128 : vector<1x1x2xf32> to vector<1x2xf32>
    %130 = vector.shape_cast %127 : vector<1x2xf32> to vector<1x1x2xf32>
    tpu.vector_store %arg13[%c0_86, %c0_87, %c0_88], %130 {strides = array<i32>} : memref<1x1x2xf32, #tpu.memory_space<vmem>>, vector<1x1x2xf32>,
    return
  }
  func.func @transform_0(%arg0: i32) -> (i32, i32, i32) {
    %c0_i32 = arith.constant 0 : i32
    %c0_i32_0 = arith.constant 0 : i32
    %c0_i32_1 = arith.constant 0 : i32
    return %arg0, %c0_i32, %c0_i32_0 : i32, i32, i32
  }
  func.func @transform_1(%arg0: i32) -> (i32, i32, i32) {
    %c0_i32 = arith.constant 0 : i32
    %c0_i32_0 = arith.constant 0 : i32
    %c0_i32_1 = arith.constant 0 : i32
    return %arg0, %c0_i32, %c0_i32_0 : i32, i32, i32
  }
  func.func @transform_2(%arg0: i32) -> (i32, i32, i32) {
    %c0_i32 = arith.constant 0 : i32
    %c0_i32_0 = arith.constant 0 : i32
    %c0_i32_1 = arith.constant 0 : i32
    %c0_i32_2 = arith.constant 0 : i32
    return %c0_i32, %c0_i32_0, %c0_i32_1 : i32, i32, i32
  }
  func.func @transform_3(%arg0: i32) -> (i32, i32) {
    %c0_i32 = arith.constant 0 : i32
    %c0_i32_0 = arith.constant 0 : i32
    %c0_i32_1 = arith.constant 0 : i32
    return %c0_i32, %c0_i32_0 : i32, i32
  }
  func.func @transform_4(%arg0: i32) -> (i32, i32, i32) {
    %c0_i32 = arith.constant 0 : i32
    %c0_i32_0 = arith.constant 0 : i32
    %c0_i32_1 = arith.constant 0 : i32
    %c0_i32_2 = arith.constant 0 : i32
    return %c0_i32, %c0_i32_0, %c0_i32_1 : i32, i32, i32
  }
  func.func @transform_5(%arg0: i32) -> (i32, i32) {
    %c0_i32 = arith.constant 0 : i32
    %c0_i32_0 = arith.constant 0 : i32
    %c0_i32_1 = arith.constant 0 : i32
    return %c0_i32, %c0_i32_0 : i32, i32
  }
  func.func @transform_6(%arg0: i32) -> (i32, i32) {
    %c0_i32 = arith.constant 0 : i32
    %c0_i32_0 = arith.constant 0 : i32
    %c0_i32_1 = arith.constant 0 : i32
    return %c0_i32, %c0_i32_0 : i32, i32
  }
  func.func @transform_7(%arg0: i32) -> (i32, i32) {
    %c0_i32 = arith.constant 0 : i32
    %c0_i32_0 = arith.constant 0 : i32
    %c0_i32_1 = arith.constant 0 : i32
    return %c0_i32, %c0_i32_0 : i32, i32
  }
  func.func @transform_8(%arg0: i32) -> (i32, i32) {
    %c0_i32 = arith.constant 0 : i32
    %c0_i32_0 = arith.constant 0 : i32
    %c0_i32_1 = arith.constant 0 : i32
    return %c0_i32, %c0_i32_0 : i32, i32
  }
  func.func @transform_9(%arg0: i32) -> (i32, i32) {
    %c0_i32 = arith.constant 0 : i32
    %c0_i32_0 = arith.constant 0 : i32
    %c0_i32_1 = arith.constant 0 : i32
    return %c0_i32, %c0_i32_0 : i32, i32
  }
  func.func @transform_10(%arg0: i32) -> (i32, i32) {
    %c0_i32 = arith.constant 0 : i32
    %c0_i32_0 = arith.constant 0 : i32
    %c0_i32_1 = arith.constant 0 : i32
    return %c0_i32, %c0_i32_0 : i32, i32
  }
  func.func @transform_11(%arg0: i32) -> (i32, i32) {
    %c0_i32 = arith.constant 0 : i32
    %c0_i32_0 = arith.constant 0 : i32
    %c0_i32_1 = arith.constant 0 : i32
    return %c0_i32, %c0_i32_0 : i32, i32
  }
  func.func @transform_12(%arg0: i32) -> (i32, i32, i32) {
    %c0_i32 = arith.constant 0 : i32
    %c0_i32_0 = arith.constant 0 : i32
    %c0_i32_1 = arith.constant 0 : i32
    return %arg0, %c0_i32, %c0_i32_0 : i32, i32, i32
  }
}

</mosaic_0001>

<bundles_post_ra>
// kernel: cnn_forward.1
= control target key start
LH: loop header
LB: loop body
LE: loop exit
PB: predicated region body
PF: predicated region fallthrough
CT: control target
= control target key end

     0   :  { %s3248_s0 = inlined_call_operand.vmem [shape: f32[2,8,48], index: 0, kind: input, shape index: {}]   ;;  %s3249_s1 = inlined_call_operand.vmem [shape: f32[2,8,48], index: 1, kind: input, shape index: {}]   ;;  %s3250_s2 = inlined_call_operand.vmem [shape: f32[5,48,36], index: 2, kind: input, shape index: {}]   ;;  %s3251_s3 = inlined_call_operand.vmem [shape: f32[1,18], index: 3, kind: input, shape index: {}]   ;;  %s3252_s4 = inlined_call_operand.vmem [shape: f32[5,18,20], index: 4, kind: input, shape index: {}]   ;;  %s3253_s5 = inlined_call_operand.vmem [shape: f32[1,20], index: 5, kind: input, shape index: {}]   ;;  %s3254_s6 = inlined_call_operand.vmem [shape: f32[10,120], index: 6, kind: input, shape index: {}]   ;;  %s3255_s7 = inlined_call_operand.vmem [shape: f32[1,120], index: 7, kind: input, shape index: {}]   ;;  %s3256_s8 = inlined_call_operand.vmem [shape: f32[120,84], index: 8, kind: input, shape index: {}]   ;;  %s3257_s9 = inlined_call_operand.vmem [shape: f32[1,84], index: 9, kind: input, shape index: {}]   ;;  %s3258_s10 = inlined_call_operand.vmem [shape: f32[84,2], index: 10, kind: input, shape index: {}]   ;;  %s3259_s11 = inlined_call_operand.vmem [shape: f32[1,2], index: 11, kind: input, shape index: {}]   ;;  %s3260_s12 = inlined_call_operand.hbm [shape: f32[2,1,2], index: 12, kind: output, shape index: {}]  }
   0x1   :  { %3261 = sst [smem:[#allocation5_spill]] %s3248_s0 }
   0x2   :  { %3262 = sst [smem:[#allocation6_spill]] %s3249_s1 }
   0x3   :  { %17 = vsyncpa [#allocation3], 0 }
   0x4   :  { %19 = vsyncpa [#allocation3 + $0x1], 0  ;;  %s2614_s21 = smov 0   ;;  %s2616_s22 = smov 0  }
   0x5   :  { %s2618_s23 = smov 0   ;;  %s2620_s24 = smov 0  }
   0x6 LB: > { %s2635_s25 = sadd.s32 4294967295, %s2541_s24   ;;  %s1984_s26 = sadd.s32 4294967294, %s2541_s24   ;;  %s2541_s24 = sphi %s2620_s24, %s3270_s24   ;;  %s2537_s23 = sphi %s2618_s23, %s3269_s23   ;;  %s2533_s22 = sphi %s2616_s22, %s3268_s22   ;;  %s2529_s21 = sphi %s2614_s21, %s3267_s21  }
   0x7   : > { %s2639_s27 = sadd.s32 1, %s2541_s24   ;;  %s294_s28 = sadd.s32 1, %s2537_s23 }
   0x8   : > { %s291_s29 = ssub.s32 %s2541_s24, %s2639_s27  ;;  %p304_p0 = scmp.ne.s32.totalorder %s2537_s23, %s2533_s22 }
   0x9   : > { %p292_p1 = scmp.eq.s32.totalorder %s291_s29, 0  ;;  %p305_p2 = scmp.eq.s32.totalorder %s2635_s25, 1 }
   0xa   : > { %p310_p3 = scmp.ne.s32.totalorder %s2533_s22, %s2529_s21  ;;  %p311_p4 = scmp.eq.s32.totalorder %s1984_s26, 1 }
   0xb   : > { %s2650_s30 = scalar_select %p292_p1, %s2537_s23, %s294_s28  }
   0xc   : > { %p2652_p5 = por %p305_p2, %p304_p0  ;;  %p2656_p6 = por %p311_p4, %p310_p3 }
   0xd   : > { %p1987_p7 = scmp.ge.s32.totalorder %s2541_s24, 1  ;;  %p373_p8 = scmp.lt.s32.totalorder %s2541_s24, 3 }
   0xf   : > { %p374_p9 = pnand %p1987_p7, %p373_p8 }
  0x10   : > { %p417_p10 = scmp.lt.s32.totalorder (!%p374_p9), %s2635_s25, 1  ;;  %s3265_s1 = sld [smem:[#allocation6_spill]] (!%p374_p9) }
  0x11   : > { %377 = sbr.rel (%p374_p9) target bundleno = 1346 (0x542), region = 68  ;;  %s3266_s0 = sld [smem:[#allocation5_spill]] (!%p374_p9) }
  0x12   : > { %s2545_s15 = smov (!%p374_p9), 18   ;;  %s2547_s17 = smov (!%p374_p9), 118  }
  0x13   : > { %s415_s20 = sand.u32 (!%p374_p9), 1, %s2533_s22  }
  0x16   : > { %v2665_v0 = vld [vmem:[%s3250_s2 + $0x58] sm:$0xff]  ;;  %v2670_v1 = vld [vmem:[%s3250_s2 + $0x28] sm:$0xff]  ;;  %v2543_v2 = vmov 0.0   ;;  %v2678_v3 = vld [vmem:[%s3250_s2 + $0x50] sm:$0xff]  ;;  %s418_s29 = scalar_select %p417_p10, %s2635_s25, 1  ;;  %vm441_vm0 = vcmask 392192  }
  0x17   : > { %2177 = vmatprep.subr.mxu0 %v2543_v2  ;;  %2192 = vmatprep.subr.mxu1 %v2543_v2  ;;  %v2683_v4 = vld [vmem:[%s3250_s2 + $0x20] sm:$0xff]  ;;  %v2693_v5 = vld [vmem:[%s3250_s2 + $0x48] sm:$0xff]  ;;  %v2698_v6 = vld [vmem:[%s3250_s2 + $0x18] sm:$0xff]  ;;  %vm2544_vm1 = vmmov 0   ;;  %vm1227_vm2 = vcmask 1041408   ;;  %vm1224_vm3 = vcmask 146432  }
  0x18   : > { %2178 = vmatpush3.msra.mxu0 %v2665_v0  ;;  %2193 = vmatpush3.msra.mxu1 %v2670_v1  ;;  %s1988_s19 = sshll.u32 %s418_s29, 3  ;;  %v2707_v7 = vld [vmem:[%s3250_s2 + $0x40] sm:$0xff]  ;;  %v2712_v8 = vld [vmem:[%s3250_s2 + $0x10] sm:$0xff]  ;;  %v2721_v9 = vld [vmem:[%s3250_s2 + $0x38] sm:$0xff]  ;;  %vm1643_vm4 = vcmask 80896   ;;  %vm1828_vm5 = vcmask 1043456  }
  0x19   : > { %2179 = vmatprep.subr.mxu0 %v2543_v2  ;;  %2194 = vmatprep.subr.mxu1 %v2543_v2  ;;  %v2726_v10 = vld [vmem:[%s3250_s2 + $0x8] sm:$0xff]  ;;  %s424_s28 = scalar_lea.vmem %s3265_s1, %s1988_s19  ;;  %v2738_v11 = vld [vmem:[%s3250_s2 + $0x30] sm:$0xff]  ;;  %s420_s18 = scalar_lea.vmem %s3266_s0, %s1988_s19  ;;  %v2748_v12 = vld [vmem:[%s3250_s2] sm:$0xff]  ;;  %vm1737_vm6 = vcmask 982016   ;;  %vm1824_vm7 = vcmask 687104   ;;  %vm1902_vm8 = vcmask 8192  }
  0x1a   : > { %2180 = vmatpush3.msra.mxu0 %v2678_v3  ;;  %2195 = vmatpush3.msra.mxu1 %v2683_v4  ;;  %v2750_v13 = vld [vmem:[%s424_s28] sm:$0xff]  ;;  %v2765_v15 = vld [vmem:[%s3250_s2 + $0x88] sm:$0xff]  ;;  %v2770_v16 = vld [vmem:[%s3250_s2 + $0xb8] sm:$0xff]  ;;  %s2546_s19 = smov 110   ;;  %s2053_s28 = sshll.u32 %s2635_s25, 4 }
  0x1b   : > { %2181 = vmatprep.subr.mxu0 %v2543_v2  ;;  %2196 = vmatprep.subr.mxu1 %v2543_v2  ;;  %v2757_v14 = vld [vmem:[%s420_s18] sm:$0xff]  ;;  %v2786_v18 = vld [vmem:[%s3250_s2 + $0xb0] sm:$0xff]  ;;  %v2795_v19 = vld [vmem:[%s3250_s2 + $0x78] sm:$0xff]  ;;  %v676_v28 = vrot.slane %v2750_v13, 1  ;;  %v1131_v36 = vrot.slane %v2750_v13, 2  ;;  %s3213_s18 = scalar_lea.hbm %s3260_s12, %s2053_s28  ;;  %s1905_s0 = scalar_lea.sflag [#allocation3], %s415_s20 }
  0x1c   : > { %2182 = vmatpush3.msra.mxu0 %v2693_v5  ;;  %2197 = vmatpush3.msra.mxu1 %v2698_v6  ;;  %v2781_v17 = vld [vmem:[%s3250_s2 + $0x80] sm:$0xff]  ;;  %v2800_v20 = vld [vmem:[%s3250_s2 + $0xa8] sm:$0xff]  ;;  %v2809_v21 = vld [vmem:[%s3250_s2 + $0x70] sm:$0xff]  ;;  %v595_v25 = vrot.slane %v2757_v14, 1  ;;  %v757_v34 = vrot.slane %v2757_v14, 2  ;;  %s2548_s25 = smov [#allocation2]  }
  0x1d   : > { %2183 = vmatprep.subr.mxu0 %v2543_v2  ;;  %2198 = vmatprep.subr.mxu1 %v2543_v2  ;;  %v2814_v22 = vld [vmem:[%s3250_s2 + $0xa0] sm:$0xff]  ;;  %v2823_v23 = vld [vmem:[%s3250_s2 + $0x68] sm:$0xff]  ;;  %v2828_v24 = vld [vmem:[%s3250_s2 + $0x98] sm:$0xff]  ;;  %s2485_s26 = sshll.u32 %s2548_s25, 4  ;;  %s2486_s26 = int_to_ptr.vmem [resolvable:$false] %s2485_s26 }
  0x1e   : > { %2184 = vmatpush3.msra.mxu0 %v2707_v7  ;;  %2199 = vmatpush3.msra.mxu1 %v2712_v8  ;;  %v2838_v26 = vld [vmem:[%s3250_s2 + $0x60] sm:$0xff]  ;;  %v2845_v27 = vld [vmem:[%s3250_s2 + $0x90] sm:$0xff]  ;;  %v2858_v29 = vld [vmem:[%s3250_s2 + $0xe8] sm:$0xff] }
  0x1f   : > { %2185 = vmatprep.subr.mxu0 %v2543_v2  ;;  %2200 = vmatprep.subr.mxu1 %v2543_v2  ;;  %v2870_v30 = vld [vmem:[%s3250_s2 + $0xe0] sm:$0xff]  ;;  %v2879_v31 = vld [vmem:[%s3250_s2 + $0xd8] sm:$0xff]  ;;  %v2888_v32 = vld [vmem:[%s3250_s2 + $0xd0] sm:$0xff] }
  0x20   : > { %2186 = vmatpush3.msra.mxu0 %v2721_v9  ;;  %2201 = vmatpush3.msra.mxu1 %v2726_v10  ;;  %v2897_v33 = vld [vmem:[%s3250_s2 + $0xc8] sm:$0xff]  ;;  %v2907_v35 = vld [vmem:[%s3250_s2 + $0xc0] sm:$0xff]  ;;  %v1217_v47 = vld [vmem:[%s3252_s4 + $0x10] sm:$0x3] }
  0x21   : > { %2187 = vmatprep.subr.mxu0 %v2543_v2  ;;  %2202 = vmatprep.subr.mxu1 %v2543_v2  ;;  %v2985_v37 = vld [vmem:[%s3251_s3] ss:$0 sm:$0xff]  ;;  %v2027_v48 = vld [vmem:[%s3252_s4 + $0x28] sm:$0x3] }
  0x22   : > { %2188 = vmatpush3.msra.mxu0 %v2738_v11  ;;  %2189 = vmatprep.mubr.msk.f32.mxu0 %vm2544_vm1, %v2543_v2  ;;  %v1216_v49 = vld [vmem:[%s3252_s4 + $0x8] sm:$0xff] }
  0x23   : > { %2203 = vmatpush3.msra.mxu1 %v2748_v12  ;;  %2190 = vmatmul.mubr.msk.f32.vlgmr.msra.gmra.mxu0 %vm441_vm0, %v2750_v13 }
  0x24   : > { %2204 = vmatprep.mubr.msk.f32.mxu1 %vm2544_vm1, %v2543_v2  ;;  %2207 = vmatprep.subr.mxu0 %v2543_v2 }
  0x25   : > { %2222 = vmatprep.subr.mxu1 %v2543_v2  ;;  %2205 = vmatmul.mubr.msk.f32.vlgmr.msra.gmra.mxu1 %vm441_vm0, %v2757_v14 }
  0x26   : > { %2208 = vmatpush3.msra.mxu0 %v2765_v15  ;;  %2223 = vmatpush3.msra.mxu1 %v2770_v16 }
  0x27   : > { %2209 = vmatprep.subr.mxu0 %v2543_v2  ;;  %2224 = vmatprep.subr.mxu1 %v2543_v2 }
  0x28   : > { %2210 = vmatpush3.msra.mxu0 %v2781_v17  ;;  %2225 = vmatpush3.msra.mxu1 %v2786_v18 }
  0x29   : > { %2211 = vmatprep.subr.mxu0 %v2543_v2  ;;  %2226 = vmatprep.subr.mxu1 %v2543_v2 }
  0x2a   : > { %2212 = vmatpush3.msra.mxu0 %v2795_v19  ;;  %2227 = vmatpush3.msra.mxu1 %v2800_v20 }
  0x2b   : > { %2213 = vmatprep.subr.mxu0 %v2543_v2  ;;  %2228 = vmatprep.subr.mxu1 %v2543_v2 }
  0x2c   : > { %2214 = vmatpush3.msra.mxu0 %v2809_v21  ;;  %2229 = vmatpush3.msra.mxu1 %v2814_v22 }
  0x2d   : > { %2215 = vmatprep.subr.mxu0 %v2543_v2  ;;  %2230 = vmatprep.subr.mxu1 %v2543_v2 }
  0x2e   : > { %2216 = vmatpush3.msra.mxu0 %v2823_v23  ;;  %2231 = vmatpush3.msra.mxu1 %v2828_v24 }
  0x2f   : > { %2217 = vmatprep.subr.mxu0 %v2543_v2  ;;  %2232 = vmatprep.subr.mxu1 %v2543_v2 }
  0x30   : > { %2218 = vmatpush3.msra.mxu0 %v2838_v26  ;;  %2219 = vmatprep.mubr.msk.f32.mxu0 %vm2544_vm1, %v2543_v2 }
  0x31   : > { %2233 = vmatpush3.msra.mxu1 %v2845_v27  ;;  %2220 = vmatmul.mubr.msk.f32.vlgmr.msra.gmra.mxu0 %vm441_vm0, %v595_v25 }
  0x32   : > { %2234 = vmatprep.mubr.msk.f32.mxu1 %vm2544_vm1, %v2543_v2  ;;  %2237 = vmatprep.subr.mxu0 %v2543_v2 }
  0x33   : > { %2252 = vmatprep.subr.mxu1 %v2543_v2  ;;  %2235 = vmatmul.mubr.msk.f32.vlgmr.msra.gmra.mxu1 %vm441_vm0, %v676_v28 }
  0x34   : > { %2238 = vmatpush3.msra.mxu0 %v2858_v29  ;;  %2253 = vmatpush3.msra.mxu1 %v2665_v0 }
  0x35   : > { %2239 = vmatprep.subr.mxu0 %v2543_v2  ;;  %2254 = vmatprep.subr.mxu1 %v2543_v2 }
  0x36   : > { %2240 = vmatpush3.msra.mxu0 %v2870_v30  ;;  %2255 = vmatpush3.msra.mxu1 %v2678_v3  ;;  %v1215_v3 = vld [vmem:[%s3252_s4] sm:$0xff] }
  0x37   : > { %2241 = vmatprep.subr.mxu0 %v2543_v2  ;;  %2256 = vmatprep.subr.mxu1 %v2543_v2 }
  0x38   : > { %2242 = vmatpush3.msra.mxu0 %v2879_v31  ;;  %2257 = vmatpush3.msra.mxu1 %v2693_v5 }
  0x39   : > { %2243 = vmatprep.subr.mxu0 %v2543_v2  ;;  %2258 = vmatprep.subr.mxu1 %v2543_v2 }
  0x3a   : > { %2244 = vmatpush3.msra.mxu0 %v2888_v32  ;;  %2259 = vmatpush3.msra.mxu1 %v2707_v7 }
  0x3b   : > { %2245 = vmatprep.subr.mxu0 %v2543_v2  ;;  %2260 = vmatprep.subr.mxu1 %v2543_v2 }
  0x3c   : > { %2246 = vmatpush3.msra.mxu0 %v2897_v33  ;;  %2261 = vmatpush3.msra.mxu1 %v2721_v9 }
  0x3d   : > { %2247 = vmatprep.subr.mxu0 %v2543_v2  ;;  %2262 = vmatprep.subr.mxu1 %v2543_v2 }
  0x3e   : > { %2248 = vmatpush3.msra.mxu0 %v2907_v35  ;;  %2249 = vmatprep.mubr.msk.f32.mxu0 %vm2544_vm1, %v2543_v2 }
  0x3f   : > { %2263 = vmatpush3.msra.mxu1 %v2738_v11  ;;  %2250 = vmatmul.mubr.msk.f32.vlgmr.msra.gmra.mxu0 %vm441_vm0, %v757_v34 }
  0x40   : > { %2264 = vmatprep.mubr.msk.f32.mxu1 %vm2544_vm1, %v2543_v2  ;;  %2267 = vmatprep.subr.mxu0 %v2543_v2 }
  0x41   : > { %2282 = vmatprep.subr.mxu1 %v2543_v2  ;;  %2265 = vmatmul.mubr.msk.f32.vlgmr.msra.gmra.mxu1 %vm441_vm0, %v595_v25  ;;  %v2034_v25 = vld [vmem:[%s3252_s4 + $0x40] sm:$0x3] }
  0x42   : > { %2268 = vmatpush3.msra.mxu0 %v2670_v1  ;;  %2283 = vmatpush3.msra.mxu1 %v2765_v15  ;;  %v2026_v1 = vld [vmem:[%s3252_s4 + $0x20] sm:$0xff] }
  0x43   : > { %2269 = vmatprep.subr.mxu0 %v2543_v2  ;;  %2284 = vmatprep.subr.mxu1 %v2543_v2 }
  0x44   : > { %2270 = vmatpush3.msra.mxu0 %v2683_v4  ;;  %2285 = vmatpush3.msra.mxu1 %v2781_v17  ;;  %v2025_v4 = vld [vmem:[%s3252_s4 + $0x18] sm:$0xff] }
  0x45   : > { %2271 = vmatprep.subr.mxu0 %v2543_v2  ;;  %2286 = vmatprep.subr.mxu1 %v2543_v2 }
  0x46   : > { %2272 = vmatpush3.msra.mxu0 %v2698_v6  ;;  %2287 = vmatpush3.msra.mxu1 %v2795_v19 }
  0x47   : > { %2273 = vmatprep.subr.mxu0 %v2543_v2  ;;  %2288 = vmatprep.subr.mxu1 %v2543_v2 }
  0x48   : > { %2274 = vmatpush3.msra.mxu0 %v2712_v8  ;;  %2289 = vmatpush3.msra.mxu1 %v2809_v21 }
  0x49   : > { %2275 = vmatprep.subr.mxu0 %v2543_v2  ;;  %2290 = vmatprep.subr.mxu1 %v2543_v2 }
  0x4a   : > { %2276 = vmatpush3.msra.mxu0 %v2726_v10  ;;  %2291 = vmatpush3.msra.mxu1 %v2823_v23  ;;  %v2039_v23 = vld [vmem:[%s3252_s4 + $0x58] sm:$0x3] }
  0x4b   : > { %2277 = vmatprep.subr.mxu0 %v2543_v2  ;;  %2292 = vmatprep.subr.mxu1 %v2543_v2 }
  0x4c   : > { %2278 = vmatpush3.msra.mxu0 %v2748_v12  ;;  %2279 = vmatprep.mubr.msk.f32.mxu0 %vm2544_vm1, %v2543_v2 }
  0x4d   : > { %2293 = vmatpush3.msra.mxu1 %v2838_v26  ;;  %2280 = vmatmul.mubr.msk.f32.vlgmr.msra.gmra.mxu0 %vm441_vm0, %v2750_v13  ;;  %v2038_v26 = vld [vmem:[%s3252_s4 + $0x50] sm:$0xff] }
  0x4e   : > { %2294 = vmatprep.mubr.msk.f32.mxu1 %vm2544_vm1, %v2543_v2  ;;  %2297 = vmatprep.subr.mxu0 %v2543_v2 }
  0x4f   : > { %2312 = vmatprep.subr.mxu1 %v2543_v2  ;;  %2295 = vmatmul.mubr.msk.f32.vlgmr.msra.gmra.mxu1 %vm441_vm0, %v676_v28  ;;  %v2037_v28 = vld [vmem:[%s3252_s4 + $0x48] sm:$0xff] }
  0x50   : > { %2298 = vmatpush3.msra.mxu0 %v2770_v16  ;;  %2313 = vmatpush3.msra.mxu1 %v2858_v29 }
  0x51   : > { %2299 = vmatprep.subr.mxu0 %v2543_v2  ;;  %2314 = vmatprep.subr.mxu1 %v2543_v2 }
  0x52   : > { %2300 = vmatpush3.msra.mxu0 %v2786_v18  ;;  %2315 = vmatpush3.msra.mxu1 %v2870_v30  ;;  %v2032_v30 = vld [vmem:[%s3252_s4 + $0x30] sm:$0xff] }
  0x53   : > { %2301 = vmatprep.subr.mxu0 %v2543_v2  ;;  %2316 = vmatprep.subr.mxu1 %v2543_v2 }
  0x54   : > { %2302 = vmatpush3.msra.mxu0 %v2800_v20  ;;  %2317 = vmatpush3.msra.mxu1 %v2879_v31 }
  0x55   : > { %2303 = vmatprep.subr.mxu0 %v2543_v2  ;;  %2318 = vmatprep.subr.mxu1 %v2543_v2 }
  0x56   : > { %2304 = vmatpush3.msra.mxu0 %v2814_v22  ;;  %2319 = vmatpush3.msra.mxu1 %v2888_v32  ;;  %v2044_v32 = vld [vmem:[%s3252_s4 + $0x70] sm:$0x3] }
  0x57   : > { %2305 = vmatprep.subr.mxu0 %v2543_v2  ;;  %2320 = vmatprep.subr.mxu1 %v2543_v2 }
  0x58   : > { %2306 = vmatpush3.msra.mxu0 %v2828_v24  ;;  %2321 = vmatpush3.msra.mxu1 %v2897_v33  ;;  %v2043_v33 = vld [vmem:[%s3252_s4 + $0x68] sm:$0xff] }
  0x59   : > { %2307 = vmatprep.subr.mxu0 %v2543_v2  ;;  %2322 = vmatprep.subr.mxu1 %v2543_v2 }
  0x5a   : > { %2308 = vmatpush3.msra.mxu0 %v2845_v27  ;;  %2309 = vmatprep.mubr.msk.f32.mxu0 %vm2544_vm1, %v2543_v2  ;;  %v2033_v27 = vld [vmem:[%s3252_s4 + $0x38] sm:$0xff] }
  0x5b   : > { %2323 = vmatpush3.msra.mxu1 %v2907_v35  ;;  %2324 = vmatprep.mubr.msk.f32.mxu1 %vm2544_vm1, %v2543_v2 }
  0x5c   : > { %2310 = vmatmul.mubr.msk.f32.vlgmr.msra.gmra.mxu0 %vm441_vm0, %v757_v34  ;;  %2325 = vmatmul.mubr.msk.f32.vlgmr.msra.gmra.mxu1 %vm441_vm0, %v1131_v36  ;;  %v2042_v34 = vld [vmem:[%s3252_s4 + $0x60] sm:$0xff] }
  0x5d   : > { %839 = vrot.lane.b32.xlu0 %v2985_v37, %s2545_s15  ;;  %2336 = vmatprep.subr.mxu1 %v2543_v2  ;;  %s416_s15 = scalar_lea.vmem [#allocation2], %s415_s20 }
  0x5e   : > { %2327 = vmatprep.subr.mxu0 %v2543_v2  ;;  %2342 = vmatprep.mubr.msk.f32.mxu1 %vm2544_vm1, %v2543_v2  ;;  %s1917_s29 = sshll.u32 %s416_s15, 4  ;;  %s1918_s29 = int_to_ptr.vmem [resolvable:$true] %s1917_s29 }
  0x5f   : > { %2333 = vmatprep.mubr.msk.f32.mxu0 %vm2544_vm1, %v2543_v2  ;;  %2337 = vmatpush3.msk.msra.mxu1 %vm1227_vm2, %v1217_v47  ;;  %v1640_v47 = vld [vmem:[%s3254_s6] sm:$0xff]  ;;  %s2481_s1 = scalar_lea.vmem %s1918_s29, 16  ;;  %p2488_p0 = scmp.lt.s32.totalorder %s1918_s29, %s2486_s26 }
  0x60   : > { %2328 = vmatpush3.msk.msra.mxu0 %vm1227_vm2, %v2027_v48  ;;  %2338 = vmatprep.subr.mxu1 %v2543_v2  ;;  %p2482_p11 = scmp.ne.s32.totalorder %s1918_s29, %s2481_s1 }
  0x61   : > { %2329 = vmatprep.subr.mxu0 %v2543_v2  ;;  %2339 = vmatpush3.msra.mxu1 %v1216_v49 }
  0x62   : > { %2340 = vmatprep.subr.mxu1 %v2543_v2  ;;  %2330 = vmatpush3.msra.mxu0 %v2026_v1  ;;  %v1726_v1 = vld [vmem:[%s3256_s8 + $0x28] sm:$0xff]  ;;  %p2483_p12 = pnand %p2482_p11, %p2652_p5 }
  0x63   : > { %2341 = vmatpush3.msra.mxu1 %v1215_v3  ;;  %2331 = vmatprep.subr.mxu0 %v2543_v2  ;;  %v1725_v3 = vld [vmem:[%s3256_s8 + $0x20] sm:$0xff] }
  0x64   : > { %2354 = vmatprep.subr.mxu1 %v2543_v2  ;;  %2332 = vmatpush3.msra.mxu0 %v2025_v4  ;;  %v1724_v4 = vld [vmem:[%s3256_s8 + $0x18] sm:$0xff]  ;;  %p2484_p13 = pneg %p2483_p12 }
  0x65   : > { %2345 = vmatprep.subr.mxu0 %v2543_v2 }
  0xcf   : > { %v840_v53 = vpop.permute.xlu0 %839 }
  0xe3   : > { %v511_v38 = vpop.f32.mrf.mxu0 }
  0xe5   : > { %v584_v39 = vpop.f32.mrf.mxu1  ;;  %v2191_v40 = vpop.f32.mrf.mxu0 }
  0xe6   : > { %v585_v46 = vadd.f32 %v584_v39, %v511_v38 }
  0xe7   : > { %v2206_v41 = vpop.f32.mrf.mxu1 }
  0xf1   : > { %v664_v42 = vpop.f32.mrf.mxu0 }
  0xf2   : > { %v668_v50 = vadd.f32 %v664_v42, %v585_v46  ;;  %v1641_v46 = vld [vmem:[%s3254_s6 + $0x8] sm:$0x3] }
  0xf3   : > { %v745_v43 = vpop.f32.mrf.mxu1  ;;  %v2221_v44 = vpop.f32.mrf.mxu0 }
  0xf4   : > { %v749_v51 = vadd.f32 %v745_v43, %v668_v50  ;;  %v2047_v50 = vld [vmem:[%s3253_s5] ss:$0 sm:$0xff] }
  0xf5   : > { %v2236_v45 = vpop.f32.mrf.mxu1 }
  0xff   : > { %v826_v52 = vpop.f32.mrf.mxu0 }
 0x100   : > { %v830_v54 = vadd.f32 %v826_v52, %v749_v51  ;;  %v1735_v51 = vld [vmem:[%s3256_s8 + $0x70] sm:$0xff]  ;;  %v1734_v52 = vld [vmem:[%s3256_s8 + $0x68] sm:$0xff] }
 0x101   : > { %v915_v55 = vpop.f32.mrf.mxu1  ;;  %v2251_v56 = vpop.f32.mrf.mxu0 }
 0x102   : > { %v842_v57 = vadd.f32 %v840_v53, %v830_v54  ;;  %v837_v14 = vadd.f32 %v2985_v37, %v830_v54 }
 0x103   : > { %v2266_v58 = vpop.f32.mrf.mxu1 }
 0x104   : > { %v843_v59 = vmax.f32 %v842_v57, 0.0  ;;  %v838_v16 = vmax.f32 %v837_v14, 0.0  ;;  %v1732_v57 = vld [vmem:[%s3256_s8 + $0x58] sm:$0xff]  ;;  %v1821_v14 = vld [vmem:[%s3258_s10 + $0x48] sm:$0xff] }
 0x106   : > { %845 = vrot.lane.b32.xlu0 %v843_v59, %s2546_s19  ;;  %v1731_v59 = vld [vmem:[%s3256_s8 + $0x50] sm:$0xff] }
 0x10d   : > { %v985_v60 = vpop.f32.mrf.mxu0 }
 0x10e   : > { %v986_v0 = vadd.f32 %v985_v60, %v915_v55  ;;  %v1733_v55 = vld [vmem:[%s3256_s8 + $0x60] sm:$0xff] }
 0x10f   : > { %v1055_v61 = vpop.f32.mrf.mxu1  ;;  %v2281_v62 = vpop.f32.mrf.mxu0 }
 0x110   : > { %v1059_v5 = vadd.f32 %v1055_v61, %v986_v0  ;;  %v1730_v61 = vld [vmem:[%s3256_s8 + $0x48] sm:$0xff]  ;;  %v1729_v62 = vld [vmem:[%s3256_s8 + $0x40] sm:$0xff]  ;;  %v1727_v0 = vld [vmem:[%s3256_s8 + $0x30] sm:$0xff] }
 0x111   : > { %v2296_v63 = vpop.f32.mrf.mxu1 }
 0x112   : > { %v1728_v63 = vld [vmem:[%s3256_s8 + $0x38] sm:$0xff] }
 0x11c   : > { %v1126_v6 = vpop.f32.mrf.mxu0  ;;  %v1200_v7 = vpop.f32.mrf.mxu1 }
 0x11d   : > { %v1130_v8 = vadd.f32 %v1126_v6, %v1059_v5 }
 0x11e   : > { %v2311_v9 = vpop.f32.mrf.mxu0  ;;  %v2326_v10 = vpop.f32.mrf.mxu1 }
 0x11f   : > { %v1204_v11 = vadd.f32 %v1200_v7, %v1130_v8  ;;  %v1723_v10 = vld [vmem:[%s3256_s8 + $0x10] sm:$0xff] }
 0x121   : > { %v1208_v12 = vadd.f32 %v1204_v11, %v840_v53  ;;  %v1205_v15 = vadd.f32 %v2985_v37, %v1204_v11  ;;  %v1722_v11 = vld [vmem:[%s3256_s8 + $0x8] sm:$0xff] }
 0x123   : > { %v1209_v13 = vmax.f32 %v1208_v12, 0.0  ;;  %v1206_v18 = vmax.f32 %v1205_v15, 0.0  ;;  %v1721_v12 = vld [vmem:[%s3256_s8] sm:$0xff] }
 0x124   : > { %v1820_v15 = vld [vmem:[%s3258_s10 + $0x40] sm:$0xff] }
 0x125   : > { %1211 = vrot.lane.b32.xlu1 %v1209_v13, %s2546_s19  ;;  %v1822_v13 = vld [vmem:[%s3258_s10 + $0x50] sm:$0xf]  ;;  %s2487_s19 = scalar_lea.vmem %s2486_s26, 32 }
 0x126   : > { %p2489_p1 = scmp.lt.s32.totalorder %s2487_s19, %s2481_s1 }
 0x128   : > { %p2490_p2 = por %p2489_p1, %p2488_p0 }
 0x12a   : > { %p2491_p3 = pnand %p2490_p2, %p2484_p13 }
 0x178   : > { %v846_v17 = vpop.permute.xlu0 %845 }
 0x179   : > { %v848_v19 = vmax.f32 %v838_v16, %v846_v17  ;;  %v1819_v16 = vld [vmem:[%s3258_s10 + $0x38] sm:$0xff]  ;;  %v1818_v17 = vld [vmem:[%s3258_s10 + $0x30] sm:$0xff] }
 0x17b   : > { %v1207_v20 = vmax.f32 %v848_v19, %v1206_v18  ;;  %v1817_v18 = vld [vmem:[%s3258_s10 + $0x28] sm:$0xff]  ;;  %v1816_v19 = vld [vmem:[%s3258_s10 + $0x20] sm:$0xff] }
 0x197   : > { %v1212_v21 = vpop.permute.xlu1 %1211 }
 0x198   : > { %v1214_v22 = vmax.f32 %v1207_v20, %v1212_v21  ;;  %v1815_v20 = vld [vmem:[%s3258_s10 + $0x18] sm:$0xff]  ;;  %v1642_v21 = vld [vmem:[%s3255_s7] sm:$0x1] }
 0x19a   : > { %2343 = vmatmul.mubr.msk.f32.vlgmr.msra.gmra.mxu1 %vm1224_vm3, %v1214_v22  ;;  %v1223_v24 = vrot.slane %v1214_v22, 1  ;;  %v1461_v29 = vrot.slane %v1214_v22, 3  ;;  %v1380_v31 = vrot.slane %v1214_v22, 2  ;;  %v1542_v35 = vrot.slane %v1214_v22, 4 }
 0x19b   : > { %2355 = vmatpush3.msk.msra.mxu1 %vm1227_vm2, %v2039_v23  ;;  %2360 = vmatprep.mubr.msk.f32.mxu1 %vm2544_vm1, %v2543_v2 }
 0x19c   : > { %2356 = vmatprep.subr.mxu1 %v2543_v2  ;;  %2334 = vmatmul.mubr.msk.f32.vlgmr.msra.gmra.mxu0 %vm1224_vm3, %v1223_v24 }
 0x19d   : > { %2346 = vmatpush3.msk.msra.mxu0 %vm1227_vm2, %v2034_v25  ;;  %2357 = vmatpush3.msra.mxu1 %v2038_v26  ;;  %v1814_v26 = vld [vmem:[%s3258_s10 + $0x10] sm:$0xff] }
 0x19e   : > { %2347 = vmatprep.subr.mxu0 %v2543_v2  ;;  %2358 = vmatprep.subr.mxu1 %v2543_v2 }
 0x19f   : > { %2348 = vmatpush3.msra.mxu0 %v2033_v27  ;;  %2359 = vmatpush3.msra.mxu1 %v2037_v28  ;;  %v1813_v27 = vld [vmem:[%s3258_s10 + $0x8] sm:$0xff]  ;;  %v1812_v28 = vld [vmem:[%s3258_s10] sm:$0xff] }
 0x1a0   : > { %2349 = vmatprep.subr.mxu0 %v2543_v2  ;;  %2361 = vmatmul.mubr.msk.f32.vlgmr.msra.gmra.mxu1 %vm1224_vm3, %v1461_v29  ;;  %v1736_v29 = vld [vmem:[%s3257_s9] sm:$0x1] }
 0x1a1   : > { %2350 = vmatpush3.msra.mxu0 %v2032_v30  ;;  %2351 = vmatprep.mubr.msk.f32.mxu0 %vm2544_vm1, %v2543_v2 }
 0x1a2   : > { %2352 = vmatmul.mubr.msk.f32.vlgmr.msra.gmra.mxu0 %vm1224_vm3, %v1380_v31  ;;  %2363 = vmatprep.subr.mxu0 %v2543_v2 }
 0x1a3   : > { %2364 = vmatpush3.msk.msra.mxu0 %vm1227_vm2, %v2044_v32  ;;  %2369 = vmatprep.mubr.msk.f32.mxu0 %vm2544_vm1, %v2543_v2 }
 0x1a4   : > { %2365 = vmatprep.subr.mxu0 %v2543_v2  ;;  %2379 = vmatprep.subr.mxu1 %v2543_v2 }
 0x1a5   : > { %2366 = vmatpush3.msra.mxu0 %v2043_v33  ;;  %2409 = vmatprep.mubr.msk.f32.mxu1 %vm2544_vm1, %v2543_v2 }
 0x1a6   : > { %2367 = vmatprep.subr.mxu0 %v2543_v2  ;;  %2380 = vmatpush3.msra.mxu1 %v1735_v51 }
 0x1a7   : > { %2368 = vmatpush3.msra.mxu0 %v2042_v34  ;;  %2381 = vmatprep.subr.mxu1 %v2543_v2 }
 0x1a8   : > { %2370 = vmatmul.mubr.msk.f32.vlgmr.msra.gmra.mxu0 %vm1224_vm3, %v1542_v35  ;;  %2372 = vmatprep.subr.mxu0 %v2543_v2 }
 0x1a9   : > { %2376 = vmatprep.mubr.msk.f32.mxu0 %vm2544_vm1, %v2543_v2  ;;  %2373 = vmatpush3.msk.msra.mxu0 %vm1227_vm2, %v1641_v46 }
 0x1aa   : > { %2374 = vmatprep.subr.mxu0 %v2543_v2  ;;  %2382 = vmatpush3.msra.mxu1 %v1734_v52 }
 0x1ab   : > { %2375 = vmatpush3.msra.mxu0 %v1640_v47  ;;  %2383 = vmatprep.subr.mxu1 %v2543_v2 }
 0x1ac   : > { %2412 = vmatprep.subr.mxu0 %v2543_v2  ;;  %2384 = vmatpush3.msra.mxu1 %v1733_v55 }
 0x1ad   : > { %2385 = vmatprep.subr.mxu1 %v2543_v2 }
 0x1ae   : > { %2386 = vmatpush3.msra.mxu1 %v1732_v57 }
 0x1af   : > { %2387 = vmatprep.subr.mxu1 %v2543_v2 }
 0x1b0   : > { %2388 = vmatpush3.msra.mxu1 %v1731_v59 }
 0x1b1   : > { %2389 = vmatprep.subr.mxu1 %v2543_v2 }
 0x1b2   : > { %2390 = vmatpush3.msra.mxu1 %v1730_v61 }
 0x1b3   : > { %2391 = vmatprep.subr.mxu1 %v2543_v2 }
 0x1b4   : > { %2392 = vmatpush3.msra.mxu1 %v1729_v62 }
 0x1b5   : > { %2393 = vmatprep.subr.mxu1 %v2543_v2 }
 0x1b6   : > { %2394 = vmatpush3.msra.mxu1 %v1728_v63 }
 0x1b7   : > { %2395 = vmatprep.subr.mxu1 %v2543_v2 }
 0x1b8   : > { %2396 = vmatpush3.msra.mxu1 %v1727_v0 }
 0x1b9   : > { %2397 = vmatprep.subr.mxu1 %v2543_v2 }
 0x1ba   : > { %2398 = vmatpush3.msra.mxu1 %v1726_v1 }
 0x1bb   : > { %2399 = vmatprep.subr.mxu1 %v2543_v2 }
 0x1bc   : > { %2400 = vmatpush3.msra.mxu1 %v1725_v3 }
 0x1bd   : > { %2401 = vmatprep.subr.mxu1 %v2543_v2 }
 0x1be   : > { %2402 = vmatpush3.msra.mxu1 %v1724_v4 }
 0x1bf   : > { %2403 = vmatprep.subr.mxu1 %v2543_v2 }
 0x1c0   : > { %2404 = vmatpush3.msra.mxu1 %v1723_v10 }
 0x1c1   : > { %2405 = vmatprep.subr.mxu1 %v2543_v2 }
 0x1c2   : > { %2406 = vmatpush3.msra.mxu1 %v1722_v11 }
 0x1c3   : > { %2407 = vmatprep.subr.mxu1 %v2543_v2 }
 0x1c4   : > { %2408 = vmatpush3.msra.mxu1 %v1721_v12 }
 0x25a   : > { %v1372_v36 = vpop.f32.mrf.mxu1 }
 0x25c   : > { %v1297_v37 = vpop.f32.mrf.mxu0  ;;  %v2344_v38 = vpop.f32.mrf.mxu1 }
 0x25d   : > { %v1373_v41 = vadd.f32 %v1372_v36, %v1297_v37 }
 0x25e   : > { %v2335_v39 = vpop.f32.mrf.mxu0 }
 0x260   : > { %v1533_v40 = vpop.f32.mrf.mxu1 }
 0x262   : > { %v1452_v42 = vpop.f32.mrf.mxu0  ;;  %v2362_v43 = vpop.f32.mrf.mxu1 }
 0x263   : > { %v1456_v44 = vadd.f32 %v1452_v42, %v1373_v41 }
 0x264   : > { %v2353_v45 = vpop.f32.mrf.mxu0 }
 0x265   : > { %v1537_v48 = vadd.f32 %v1533_v40, %v1456_v44 }
 0x268   : > { %v1614_v49 = vpop.f32.mrf.mxu0 }
 0x269   : > { %v1618_v53 = vadd.f32 %v1614_v49, %v1537_v48 }
 0x26a   : > { %v2371_v54 = vpop.f32.mrf.mxu0 }
 0x26b   : > { %v1626_v56 = vadd.f32 %v2047_v50, %v1618_v53 }
 0x26d   : > { %v1627_v58 = vmax.f32 %v1626_v56, 0.0 }
 0x26f   : > { %1629 = vrot.lane.b32.xlu1 %v1627_v58, %s2547_s17  ;;  %v1633_v60 = vrot.slane %v1627_v58, 1 }
 0x271   : > { %1636 = vrot.lane.b32.xlu0 %v1633_v60, %s2547_s17 }
 0x2e1   : > { %v1630_v5 = vpop.permute.xlu1 %1629 }
 0x2e2   : > { %v1632_v6 = vmax.f32 %v1627_v58, %v1630_v5 }
 0x2e3   : > { %v1637_v8 = vpop.permute.xlu0 %1636 }
 0x2e4   : > { %v1635_v7 = vmax.f32 %v1632_v6, %v1633_v60 }
 0x2e6   : > { %v1639_v9 = vmax.f32 %v1635_v7, %v1637_v8 }
 0x2e8   : > { %2377 = vmatmul.mubr.msk.f32.vlgmr.msra.gmra.mxu0 %vm1643_vm4, %v1639_v9 }
 0x2e9   : > { %2434 = vmatprep.mubr.msk.f32.mxu0 %vm2544_vm1, %v2543_v2  ;;  %2413 = vmatpush3.msk.msra.mxu0 %vm1828_vm5, %v1822_v13 }
 0x2ea   : > { %2414 = vmatprep.subr.mxu0 %v2543_v2 }
 0x2eb   : > { %2415 = vmatpush3.msra.mxu0 %v1821_v14 }
 0x2ec   : > { %2416 = vmatprep.subr.mxu0 %v2543_v2 }
 0x2ed   : > { %2417 = vmatpush3.msra.mxu0 %v1820_v15 }
 0x2ee   : > { %2418 = vmatprep.subr.mxu0 %v2543_v2 }
 0x2ef   : > { %2419 = vmatpush3.msra.mxu0 %v1819_v16 }
 0x2f0   : > { %2420 = vmatprep.subr.mxu0 %v2543_v2 }
 0x2f1   : > { %2421 = vmatpush3.msra.mxu0 %v1818_v17 }
 0x2f2   : > { %2422 = vmatprep.subr.mxu0 %v2543_v2 }
 0x2f3   : > { %2423 = vmatpush3.msra.mxu0 %v1817_v18 }
 0x2f4   : > { %2424 = vmatprep.subr.mxu0 %v2543_v2 }
 0x2f5   : > { %2425 = vmatpush3.msra.mxu0 %v1816_v19 }
 0x2f6   : > { %2426 = vmatprep.subr.mxu0 %v2543_v2 }
 0x2f7   : > { %2427 = vmatpush3.msra.mxu0 %v1815_v20 }
 0x2f8   : > { %2428 = vmatprep.subr.mxu0 %v2543_v2 }
 0x2f9   : > { %2429 = vmatpush3.msra.mxu0 %v1814_v26 }
 0x2fa   : > { %2430 = vmatprep.subr.mxu0 %v2543_v2 }
 0x2fb   : > { %2431 = vmatpush3.msra.mxu0 %v1813_v27 }
 0x2fc   : > { %2432 = vmatprep.subr.mxu0 %v2543_v2  ;;  %v1823_v2 = vld [vmem:[%s3259_s11] sm:$0x1] }
 0x2fd   : > { %2433 = vmatpush3.msra.mxu0 %v1812_v28 }
 0x3a8   : > { %v1716_v22 = vpop.f32.mrf.mxu0 }
 0x3a9   : > { %v1717_v23 = vadd.f32 %v1716_v22, %v1642_v21 }
 0x3aa   : > { %v2378_v24 = vpop.f32.mrf.mxu0 }
 0x3ab   : > { %v1720_v25 = vmax.f32 %v1717_v23, 0.0 }
 0x3ad   : > { %2410 = vmatmul.mubr.msk.f32.vlgmr.msra.gmra.mxu1 %vm1737_vm6, %v1720_v25 }
 0x46d   : > { %v1807_v30 = vpop.f32.mrf.mxu1 }
 0x46e   : > { %v1808_v31 = vadd.f32 %v1807_v30, %v1736_v29 }
 0x46f   : > { %v2411_v32 = vpop.f32.mrf.mxu1 }
 0x470   : > { %v1811_v33 = vmax.f32 %v1808_v31, 0.0 }
 0x472   : > { %2435 = vmatmul.mubr.msk.f32.vlgmr.msra.gmra.mxu0 %vm1824_vm7, %v1811_v33 }
 0x532   : > { %v1898_v34 = vpop.f32.mrf.mxu0 }
 0x533   : > { %v1899_v35 = vadd.f32 %v1898_v34, %v1823_v2 }
 0x534   : > { %v2436_v36 = vpop.f32.mrf.mxu0 }
 0x535   : > { %1903 = vst.msk [vmem:[%s416_s15] sm:$0x1] %vm1902_vm8, %v1899_v35 }
 0x536   : > { %2494 = shalt.err (!%p2491_p3)
}
 0x537   : > { %s2495_s28 = scalar_lea.hbm %s3213_s18, 16  ;;  %s2499_s16 = scalar_lea.hbm %s3260_s12, 32 }
 0x538   : > { %p2496_p4 = scmp.ne.s32.totalorder %s3213_s18, %s2495_s28  ;;  %p2500_p9 = scmp.lt.s32.totalorder %s3213_s18, %s3260_s12 }
 0x539   : > { %p2501_p10 = scmp.lt.s32.totalorder %s2499_s16, %s2495_s28 }
 0x53a   : > { %p2497_p7 = pnand %p2496_p4, %p2652_p5 }
 0x53b   : > { %p2502_p11 = por %p2501_p10, %p2500_p9 }
 0x53c   : > { %p2498_p8 = pneg %p2497_p7 }
 0x53e   : > { %p2503_p12 = pnand %p2502_p11, %p2498_p8 }
 0x540   : > { %2506 = shalt.err (!%p2503_p12)
}
 0x541   : > { %2437 = dma.vmem_to_hbm [thread:$0]  (%p2652_p5), %s1918_s29, 16, %s3213_s18, %s1905_s0  }
 0x542 PF: > { %p2443_p13 = scmp.ge.s32.totalorder %s2541_s24, 2  ;;  %s1929_s1 = sand.u32 1, %s2529_s21  }
 0x543   : > { %s1930_s26 = scalar_lea.sflag [#allocation3], %s1929_s1 }
 0x544   : > { %p2440_p0 = pnand %p2443_p13, %p2656_p6 }
 0x546   : > { %p2441_p1 = pneg %p2440_p0 }
 0x548   : > { %2524 = dma.done.wait (%p2441_p1), %s1930_s26, 16  }
 0x549   : > { %2526 = vsyncadd (%p2441_p1), %s1930_s26, 4294967280  ;;  %p22_p2 = scmp.ge.s32.totalorder %s2639_s27, 4   ;;  %s3267_s21 = smov %s2533_s22 }
 0x54a   : > { %s3268_s22 = smov %s2537_s23  ;;  %s3269_s23 = smov %s2650_s30 }
 0x54b   : > { %s3270_s24 = smov %s2639_s27  ;;  %24 = sbr.rel (!%p22_p2) target bundleno = 6 (0x6), region = 114 }
 0x550   :  { %1934 = vsyncpa [#allocation3], 1 }
 0x551   :  { %1936 = vsyncpa [#allocation3 + $0x1], 1 }

</bundles_post_ra>
